<compile_context>
chip_gen: v6e
topology: v6e:2x2x1
jax: 0.10.0
libtpu: 0.0.40
codegen_flags: <defaults>
</compile_context>

<pallas_src>
import jax
import jax.numpy as jnp
from jax.experimental import pallas as pl
from jax.experimental.pallas import tpu as pltpu


def _learned_encoding_kernel(x_ref, enc_ref, o_ref):
    # x_ref / o_ref: (tB, tN); enc_ref: (1, tN) — broadcast over batch rows.
    o_ref[...] = x_ref[...] + enc_ref[...]


def _sublane_multiple(dtype):
    # Second-to-last block dim requirement: 8 for 32-bit, 16 for 16-bit, 32 for 8-bit.
    return {4: 8, 2: 16, 1: 32}.get(jnp.dtype(dtype).itemsize, 8)


def _largest_divisor_multiple(n, base, cap):
    """Largest d <= cap with d % base == 0 and n % d == 0 (None if none)."""
    best = None
    for d in range(base, min(n, cap) + 1, base):
        if n % d == 0:
            best = d
    return best


def _pick_tiles(B, N, itemsize, sub, target_bytes):
    """Choose (tB, tN).  N is guaranteed 128-aligned whenever tiling is needed."""
    if B * N * itemsize <= target_bytes:
        return B, N                                   # single block, grid = (1, 1)

    # Batch-first: keep tN == N (contiguous HBM slabs, enc DMA'd once total)
    # whenever a minimal (sub, N) row slab fits and B has a sub-aligned divisor.
    if sub * N * itemsize <= target_bytes:
        cap_b = max(sub, target_bytes // (N * itemsize))
        tB = _largest_divisor_multiple(B, sub, min(B, cap_b))
        if tB is not None:
            return tB, N

    # Fall back to splitting the (128-aligned) lane axis.
    cap_n = max(128, target_bytes // max(1, B * itemsize))
    tN = _largest_divisor_multiple(N, 128, min(N, cap_n)) or N

    tB = B
    if B * tN * itemsize > target_bytes:              # very large batch: tile B too
        cap_b = max(sub, target_bytes // max(1, tN * itemsize))
        tB_cand = _largest_divisor_multiple(B, sub, min(B, cap_b))
        if tB_cand is not None:
            tB = tB_cand
    return tB, tN


def learned_encoding_forward(
    x,
    encoding,
    *,
    target_block_bytes=8 * 1024 * 1024,    # ~8 MiB per x/out block (see header)
    vmem_limit_bytes=48 * 1024 * 1024,     # safe on v5e/v6e (128 MiB) and v7x (64 MiB)
    donate_x=False,
):
    """x: (B, S, D); encoding: (max_seq_len, D). Returns x + encoding[:S]."""
    B, S, D = x.shape
    # Static slice (glue, stays in plain JAX) + promotion choice: x.dtype.
    enc = encoding[:S, :].astype(x.dtype)

    N = S * D
    itemsize = jnp.dtype(x.dtype).itemsize
    sub = _sublane_multiple(x.dtype)

    x2 = x.reshape(B, N)        # contiguous flatten of (S, D) -> lane-dense axis
    enc2 = enc.reshape(1, N)

    # Pad N up to a multiple of 128 only when the problem actually needs tiling
    # and N is unaligned (keeps blocks selectable / vst unmasked for odd shapes).
    Np = N
    needs_tiling = B * N * itemsize > target_block_bytes
    if needs_tiling and N % 128 != 0:
        Np = ((N + 127) // 128) * 128
        pad = Np - N
        x2 = jnp.pad(x2, ((0, 0), (0, pad)))
        enc2 = jnp.pad(enc2, ((0, 0), (0, pad)))

    tB, tN = _pick_tiles(B, Np, itemsize, sub, target_block_bytes)
    grid = (Np // tN, B // tB)   # (column tiles [outer], batch tiles [inner])

    out2 = pl.pallas_call(
        _learned_encoding_kernel,
        out_shape=jax.ShapeDtypeStruct((B, Np), x.dtype),
        grid_spec=pltpu.PrefetchScalarGridSpec(
            num_scalar_prefetch=0,
            grid=grid,
            in_specs=[
                pl.BlockSpec((tB, tN), lambda j, i: (i, j)),
                # enc block index depends only on the outer column axis ->
                # re-DMA skipped across the inner batch loop; with batch-first
                # tiling (tN == Np) it is DMA'd exactly once for the whole grid.
                pl.BlockSpec((1, tN), lambda j, i: (0, j)),
            ],
            out_specs=pl.BlockSpec((tB, tN), lambda j, i: (i, j)),
        ),
        compiler_params=pltpu.CompilerParams(
            # No reduction / carried state anywhere: both axes parallel so the
            # grid shards over whichever axis has >1 step (v7x: 2 TCs).
            dimension_semantics=("parallel", "parallel"),
            vmem_limit_bytes=vmem_limit_bytes,
        ),
        cost_estimate=pl.CostEstimate(
            flops=B * Np,
            bytes_accessed=(2 * B * Np + Np) * itemsize,
            transcendentals=0,
        ),
        input_output_aliases=({0: 0} if donate_x else {}),
    )(x2, enc2)

    if Np != N:
        out2 = out2[:, :N]
    return out2.reshape(B, S, D)


if __name__ == "__main__":
    # Deterministic inputs mimicking nn.init.uniform_(enc, -0.1, 0.1).
    d_model = 32
    max_seq_len = 16
    batch = 2
    seq = 8  # x.shape[1] <= max_seq_len

    key = jax.random.PRNGKey(0)
    k_enc, k_x = jax.random.split(key)
    encoding = jax.random.uniform(
        k_enc, (max_seq_len, d_model), dtype=jnp.float32,
        minval=-0.1, maxval=0.1,
    )
    x = jax.random.normal(k_x, (batch, seq, d_model), dtype=jnp.float32)

    out = jax.block_until_ready(learned_encoding_forward(x, encoding))
    ref = x + encoding[:seq, :][None, :, :]
    assert out.shape == (batch, seq, d_model)
    assert jnp.allclose(out, ref, atol=1e-6, rtol=1e-6), "mismatch vs reference"

    # Check 2: lane-tiled fallback path (small budget forces column splitting).
    k2, k3 = jax.random.split(k_x)
    enc_b = jax.random.uniform(k2, (64, 256), dtype=jnp.float32,
                               minval=-0.1, maxval=0.1)
    x_b = jax.random.normal(k3, (2, 64, 256), dtype=jnp.float32)
    out_b = jax.block_until_ready(
        learned_encoding_forward(x_b, enc_b, target_block_bytes=32 * 1024))
    ref_b = x_b + enc_b[None, :, :]
    assert jnp.allclose(out_b, ref_b, atol=1e-6, rtol=1e-6), "lane-tiled mismatch"

    # Check 3: batch-first tiling path (contiguous row slabs, grid over batch).
    k4, k5 = jax.random.split(k2)
    enc_c = jax.random.uniform(k4, (64, 128), dtype=jnp.float32,
                               minval=-0.1, maxval=0.1)
    x_c = jax.random.normal(k5, (16, 64, 128), dtype=jnp.float32)
    out_c = jax.block_until_ready(
        learned_encoding_forward(x_c, enc_c, target_block_bytes=256 * 1024))
    ref_c = x_c + enc_c[None, :, :]
    assert jnp.allclose(out_c, ref_c, atol=1e-6, rtol=1e-6), "batch-tiled mismatch"

    # Check 4: unaligned-N path (N % 128 != 0 and tiling needed -> pad + slice).
    k6, k7 = jax.random.split(k4)
    enc_d = jax.random.uniform(k6, (16, 100), dtype=jnp.float32,
                               minval=-0.1, maxval=0.1)
    x_d = jax.random.normal(k7, (4, 8, 100), dtype=jnp.float32)
    out_d = jax.block_until_ready(
        learned_encoding_forward(x_d, enc_d, target_block_bytes=4 * 1024))
    ref_d = x_d + enc_d[:8, :][None, :, :]
    assert jnp.allclose(out_d, ref_d, atol=1e-6, rtol=1e-6), "padded path mismatch"

    print("KERNEL_OK")
</pallas_src>

<mosaic_0001>
module attributes {stable_mosaic.version = 11 : i64} {
  func.func @_learned_encoding_kernel(%arg0: i32, %arg1: i32, %arg2: memref<2x256xf32, #tpu.memory_space<vmem>>, %arg3: memref<1x256xf32, #tpu.memory_space<vmem>>, %arg4: memref<2x256xf32, #tpu.memory_space<vmem>>) attributes {dimension_semantics = [#tpu.dimension_semantics<parallel>, #tpu.dimension_semantics<parallel>], iteration_bounds = array<i64: 1, 1>, scalar_prefetch = 0 : i64, scratch_operands = 0 : i64, tpu.core_type = #tpu.core_type<tc>, window_params = [{transform_indices = @transform_0, window_bounds = array<i64: 2, 256>}, {transform_indices = @transform_1, window_bounds = array<i64: 1, 256>}, {transform_indices = @transform_2, window_bounds = array<i64: 2, 256>}]} {
    %c0 = arith.constant 0 : index
    %c0_0 = arith.constant 0 : index
    %0 = vector.load %arg2[%c0, %c0_0] : memref<2x256xf32, #tpu.memory_space<vmem>>, vector<2x256xf32>
    %c0_1 = arith.constant 0 : index
    %c0_2 = arith.constant 0 : index
    %1 = vector.load %arg3[%c0_1, %c0_2] : memref<1x256xf32, #tpu.memory_space<vmem>>, vector<1x256xf32>
    %2 = vector.broadcast %1 : vector<1x256xf32> to vector<2x256xf32>
    %3 = arith.addf %0, %2 : vector<2x256xf32>
    %c0_3 = arith.constant 0 : index
    %c0_4 = arith.constant 0 : index
    %4 = vector.load %arg4[%c0_3, %c0_4] : memref<2x256xf32, #tpu.memory_space<vmem>>, vector<2x256xf32>
    tpu.vector_store %arg4[%c0_3, %c0_4], %3 {strides = array<i32>} : memref<2x256xf32, #tpu.memory_space<vmem>>, vector<2x256xf32>,
    return
  }
  func.func @transform_0(%arg0: i32, %arg1: i32) -> (i32, i32) {
    %c0_i32 = arith.constant 0 : i32
    return %arg1, %arg0 : i32, i32
  }
  func.func @transform_1(%arg0: i32, %arg1: i32) -> (i32, i32) {
    %c0_i32 = arith.constant 0 : i32
    %c0_i32_0 = arith.constant 0 : i32
    return %c0_i32, %arg0 : i32, i32
  }
  func.func @transform_2(%arg0: i32, %arg1: i32) -> (i32, i32) {
    %c0_i32 = arith.constant 0 : i32
    return %arg1, %arg0 : i32, i32
  }
}

</mosaic_0001>

<bundles_post_ra>
// kernel: tpu_custom_call.1
= control target key start
LH: loop header
LB: loop body
LE: loop exit
PB: predicated region body
PF: predicated region fallthrough
CT: control target
= control target key end

     0   :  { %7 = vsyncpa [#allocation3], 0  ;;  %s172_s0 = inlined_call_operand.hbm [shape: f32[2,256], index: 0, kind: input, shape index: {}]   ;;  %s173_s1 = inlined_call_operand.hbm [shape: f32[1,256], index: 1, kind: input, shape index: {}]   ;;  %s174_s2 = inlined_call_operand.hbm [shape: f32[2,256], index: 2, kind: output, shape index: {}]  }
   0x1   :  { %8 = vsyncpa [#allocation6], 0 }
   0x2   :  { %9 = vsyncpa [#allocation4], 0  ;;  %s144_s9 = smov [#allocation2]   ;;  %s145_s11 = smov [#allocation5]  }
   0x3   :  { %s16_s10 = sshll.u32 %s144_s9, 4  ;;  %s26_s12 = sshll.u32 %s145_s11, 4  ;;  %s17_s10 = int_to_ptr.vmem [resolvable:$true] %s16_s10  ;;  %s27_s12 = int_to_ptr.vmem [resolvable:$true] %s26_s12 }
   0x4   :  { %s86_s13 = scalar_lea.vmem %s17_s10, 64  ;;  %p91_p1 = scmp.lt.s32.totalorder %s17_s10, %s17_s10 }
   0x5   :  { %p87_p0 = scmp.ne.s32.totalorder %s17_s10, %s86_s13  ;;  %p92_p2 = scmp.lt.s32.totalorder %s86_s13, %s86_s13 }
   0x7   :  { %p93_p3 = por %p92_p2, %p91_p1 }
   0x9   :  { %p94_p4 = pnand %p93_p3, %p87_p0 }
   0xb   :  { %97 = shalt.err (!%p94_p4)
}
   0xc   :  { %19 = dma.hbm_to_vmem [thread:$0]  %s172_s0, 64, %s17_s10, [#allocation3]  }
   0xd   :  { %s106_s16 = scalar_lea.vmem %s27_s12, 32  ;;  %p111_p6 = scmp.lt.s32.totalorder %s27_s12, %s27_s12 }
   0xe   :  { %p107_p5 = scmp.ne.s32.totalorder %s27_s12, %s106_s16  ;;  %p112_p7 = scmp.lt.s32.totalorder %s106_s16, %s106_s16 }
  0x10   :  { %p113_p8 = por %p112_p7, %p111_p6 }
  0x12   :  { %p114_p9 = pnand %p113_p8, %p107_p5 }
  0x14   :  { %117 = shalt.err (!%p114_p9)
}
  0x15   :  { %29 = dma.hbm_to_vmem [thread:$0]  %s173_s1, 32, %s27_s12, [#allocation6]  }
  0x16   :  { %138 = dma.done.wait [#allocation3], 64  }
  0x17   :  { %139 = vsyncadd [#allocation3], 4294967232 }
  0x18   :  { %140 = dma.done.wait [#allocation6], 32  }
  0x19   :  { %141 = vsyncadd [#allocation6], 4294967264  ;;  %v39_v0 = vlaneseq  ;;  %v146_v1 = vmov 1983009808   ;;  %v37_v7 = vld [vmem:[#allocation5] sm:$0x3] }
  0x1a   :  { %v49_v2 = vunpack.c.l.s4 %v146_v1  ;;  %v36_v12 = vld [vmem:[#allocation2] sm:$0xf]  ;;  %s147_s0 = smov [#allocation7]  }
  0x1b   :  { %v40_v3 = vshrl.u32 %v39_v0, 7  ;;  %s64_s19 = sshll.u32 %s147_s0, 4  ;;  %s65_s19 = int_to_ptr.vmem [resolvable:$true] %s64_s19 }
  0x1c   :  { %v50_v6 = vunpack.c.0.s8 %v49_v2  ;;  %s118_s1 = scalar_lea.vmem %s65_s19, 64  ;;  %p123_p11 = scmp.lt.s32.totalorder %s65_s19, %s65_s19 }
  0x1d   :  { %v41_v4 = vsub.s32 0, %v40_v3  ;;  %v45_v5 = vsub.s32 1, %v40_v3  ;;  %p119_p10 = scmp.ne.s32.totalorder %s65_s19, %s118_s1  ;;  %p124_p12 = scmp.lt.s32.totalorder %s118_s1, %s118_s1 }
  0x1e   :  { %v53_v10 = vsub.s32 %v50_v6, %v40_v3 }
  0x1f   :  { %v42_v8 = vrot.slane %v37_v7, %v41_v4  ;;  %v46_v9 = vrot.slane %v37_v7, %v45_v5  ;;  %p125_p13 = por %p124_p12, %p123_p11 }
  0x21   :  { %v47_v11 = vcombine.low %v42_v8, %v46_v9  ;;  %p126_p0 = pnand %p125_p13, %p119_p10 }
  0x23   :  { %v54_v13 = vrot.slane %v47_v11, %v53_v10 }
  0x25   :  { %v56_v14 = vadd.f32 %v54_v13, %v36_v12 }
  0x27   :  { %57 = vst [vmem:[#allocation7] sm:$0xf] %v56_v14 }
  0x28   :  { %129 = shalt.err (!%p126_p0)
}
  0x29   :  { %67 = dma.vmem_to_hbm [thread:$0]  %s65_s19, 64, %s174_s2, [#allocation4]  }
  0x2a   :  { %142 = dma.done.wait [#allocation4], 64  }
  0x2b   :  { %143 = vsyncadd [#allocation4], 4294967232 }
  0x2c   :  { %71 = vsyncpa [#allocation3], 1 }
  0x2d   :  { %72 = vsyncpa [#allocation6], 1 }
  0x2e   :  { %73 = vsyncpa [#allocation4], 1 }

</bundles_post_ra>
